<compile_context>
chip_gen: v5e
topology: v5e:2x2
jax: 0.10.0
libtpu: 0.0.40
codegen_flags: <defaults>
</compile_context>

<pallas_src>
import jax
import jax.numpy as jnp
from jax.experimental import pallas as pl
from jax.experimental.pallas import tpu as pltpu


# ----------------------------- Pallas kernel -----------------------------

def _ffn_kernel(x_ref, w13_ref, w2_ref, o_ref):
    """One (tm, D) output tile; reduces over the intermediate dim I along grid axis 1.

    x_ref   : (tm, D)     bf16 activation tile
    w13_ref : (D, 2*ti)   bf16 fused [w1_tile | w3_tile] weight tile
    w2_ref  : (ti, D)     bf16 down-projection weight tile
    o_ref   : (tm, D)     f32 output tile; resident across j -> used as the accumulator
    """
    j = pl.program_id(1)
    ti = w2_ref.shape[0]

    x = x_ref[...]
    # Single MXU matmul covering both the gate (w1) and up (w3) projections.
    ab = jnp.dot(x, w13_ref[...], preferred_element_type=jnp.float32)       # (tm, 2*ti)
    a = ab[:, :ti]                                                          # x @ w1 tile
    b = ab[:, ti:]                                                          # x @ w3 tile

    # Numerically safe sigmoid: exp(-|a|) never overflows; exp + reciprocal go to the EUP.
    ez = jnp.exp(-jnp.abs(a))
    inv = pl.reciprocal(1.0 + ez, approx=False)
    sig = jnp.where(a >= 0, inv, ez * inv)
    h = (a * sig) * b                                                       # fp32 SwiGLU

    partial = jnp.dot(h.astype(w2_ref.dtype), w2_ref[...],
                      preferred_element_type=jnp.float32)                   # (tm, D)

    @pl.when(j == 0)
    def _first():
        # First reduction step: plain store (no zero-fill + read-modify-write).
        o_ref[...] = partial

    @pl.when(j > 0)
    def _accumulate():
        o_ref[...] += partial


# ----------------------------- config / param prep -----------------------------

def _round_up(x, m):
    return ((x + m - 1) // m) * m


def _tpu_vmem_bytes():
    try:
        return int(pltpu.get_tpu_info().vmem_capacity_bytes)
    except Exception:
        return 64 * 1024 * 1024          # conservative: v7x has 64 MiB per TensorCore


def _tile_vmem_bytes(tm, ti, D):
    """Approximate VMEM footprint of one grid step (double-buffered operands + temps)."""
    x_t = 2 * tm * D * 2                 # bf16 x tile, 2 buffers
    w13_t = 2 * D * (2 * ti) * 2         # bf16 fused w1|w3 tile, 2 buffers
    w2_t = 2 * ti * D * 2                # bf16 w2 tile, 2 buffers
    out_t = 2 * tm * D * 4               # f32 output/accumulator tile, 2 buffers
    tmp = tm * (2 * ti) * 4 + tm * ti * 4 + tm * ti * 2   # ab (f32), h (f32 + bf16 cast)
    return x_t + w13_t + w2_t + out_t + tmp


def select_ffn_config(dim, intermediate_size):
    """Pick (tm_target, ti, vmem_limit_bytes) per TPU generation."""
    vmem_phys = _tpu_vmem_bytes()
    if vmem_phys >= (100 << 20):                      # v5e / v6e: 128 MiB VMEM
        tm, ti, cap = 768, 512, 100 << 20
    else:                                             # v7x-class: 64 MiB VMEM per core
        tm, ti, cap = 512, (256 if dim >= 8192 else 512), 56 << 20
    ti = min(ti, _round_up(intermediate_size, 128))
    while tm > 128 and _tile_vmem_bytes(tm, ti, dim) > cap:
        tm -= 128
    vmem_limit = int(min(max(_tile_vmem_bytes(tm, ti, dim) + (8 << 20), 32 << 20), cap))
    return tm, ti, vmem_limit


def prepare_ffn_params(w1, w3, w2, *, ti):
    """ONE-TIME parameter prep (do not call per forward).

    w1, w3: (D, I); w2: (I, D), stored in the `x @ W` layout.
    Returns bf16 (D, 2*Ip) fused gate/up weights (per-ti-tile interleave of w1|w3) and
    bf16 (Ip, D) down-projection weights, with I zero-padded to a multiple of ti.
    Zero padding is matmul-neutral: silu(0) * 0 = 0 and padded w2 rows are zero.
    """
    D, I = w1.shape
    Ip = _round_up(I, ti)
    w1p = jnp.pad(w1, ((0, 0), (0, Ip - I))).astype(jnp.bfloat16)
    w3p = jnp.pad(w3, ((0, 0), (0, Ip - I))).astype(jnp.bfloat16)
    w2p = jnp.pad(w2, ((0, Ip - I), (0, 0))).astype(jnp.bfloat16)
    # Interleave per ti-tile so weight block j is exactly [w1[:, j*ti:(j+1)*ti] | w3[:, same]].
    w13 = jnp.concatenate(
        [w1p.reshape(D, Ip // ti, ti), w3p.reshape(D, Ip // ti, ti)], axis=-1
    ).reshape(D, 2 * Ip)
    return w13, w2p


def _pick_tm(M, tm_target):
    """Choose an M-tile that minimizes padded-row waste while staying MXU-friendly."""
    Mp8 = _round_up(max(M, 1), 8)
    tm_target = max(8, _round_up(tm_target, 8))
    if Mp8 <= tm_target:
        return Mp8
    step = 128 if tm_target >= 128 else 8
    chosen = None
    best_tm, best_waste = None, None
    cand = tm_target
    while cand >= step:
        waste = _round_up(Mp8, cand) - Mp8
        if best_waste is None or waste < best_waste:
            best_tm, best_waste = cand, waste
        if chosen is None and waste * 8 <= Mp8:   # accept the largest tile with <=12.5% waste
            chosen = cand
        cand -= step
    return chosen if chosen is not None else best_tm


# ----------------------------- forward wrapper -----------------------------

def ffn_forward(x, w13, w2, *, tm, ti, vmem_limit_bytes):
    """x: (..., D) float; w13: (D, 2*Ip) bf16 (from prepare_ffn_params); w2: (Ip, D) bf16."""
    orig_shape = x.shape
    D = orig_shape[-1]
    Ip = w2.shape[0]
    assert w13.shape == (D, 2 * Ip) and Ip % ti == 0

    x2d = x.reshape(-1, D)
    M = x2d.shape[0]
    tm = _pick_tm(M, tm)
    Mp = _round_up(M, tm)

    # Only the activations are cast/padded per call (weights were prepared once).
    xb = x2d.astype(jnp.bfloat16)
    if Mp != M:
        xb = jnp.pad(xb, ((0, Mp - M), (0, 0)))

    grid = (Mp // tm, Ip // ti)
    # TODO(synk): on v7x, when Mp // tm == 1 (decode-shaped calls) split the I reduction
    # across the two TensorCores (two partial outputs + a final add) so core 1 gets work.

    out = pl.pallas_call(
        _ffn_kernel,
        out_shape=jax.ShapeDtypeStruct((Mp, D), jnp.float32),
        grid_spec=pltpu.PrefetchScalarGridSpec(
            num_scalar_prefetch=0,
            grid=grid,
            in_specs=[
                pl.BlockSpec((tm, D), lambda i, j: (i, 0)),        # activation tile
                pl.BlockSpec((D, 2 * ti), lambda i, j: (0, j)),    # fused w1|w3 tile
                pl.BlockSpec((ti, D), lambda i, j: (j, 0)),        # w2 tile
            ],
            out_specs=pl.BlockSpec((tm, D), lambda i, j: (i, 0)),
        ),
        compiler_params=pltpu.CompilerParams(
            dimension_semantics=("parallel", "arbitrary"),
            vmem_limit_bytes=int(vmem_limit_bytes),
        ),
    )(xb, w13, w2)

    return out[:M].reshape(orig_shape)


# ----------------------------- main -----------------------------

if __name__ == "__main__":
    # Small shapes consistent with the module: batch=2, seq=8, dim=64, intermediate=256.
    B, S, D, I = 2, 8, 64, 256

    key = jax.random.PRNGKey(0)
    kx, k1, k2, k3 = jax.random.split(key, 4)

    def tnorm(k, shape, std):
        return std * jax.random.truncated_normal(k, -2.0, 2.0, shape, jnp.float32)

    init_std = 0.02                       # FeedForward.init_weights(init_std)
    x = jax.random.normal(kx, (B, S, D), jnp.float32)
    w1 = tnorm(k1, (D, I), 0.02)          # nn.Linear(dim, intermediate): y = x @ W
    w3 = tnorm(k3, (D, I), init_std)
    w2 = tnorm(k2, (I, D), init_std)      # nn.Linear(intermediate, dim)

    # fp32 reference.
    x2 = x.reshape(-1, D)
    a_ref = x2 @ w1
    ref = ((a_ref * jax.nn.sigmoid(a_ref)) * (x2 @ w3)) @ w2
    ref = ref.reshape(B, S, D)

    # 1) Hardware-selected config (trivial single-block grid at these tiny shapes).
    tm, ti, vmem_limit = select_ffn_config(D, I)
    w13, w2p = prepare_ffn_params(w1, w3, w2, ti=ti)       # one-time weight prep
    y0 = jax.block_until_ready(
        ffn_forward(x, w13, w2p, tm=tm, ti=ti, vmem_limit_bytes=vmem_limit))

    # 2) Forced small tiles (2 M-tiles x 2 I-tiles) to exercise the resident-accumulator path.
    w13_s, w2p_s = prepare_ffn_params(w1, w3, w2, ti=128)
    y1 = jax.block_until_ready(
        ffn_forward(x, w13_s, w2p_s, tm=8, ti=128, vmem_limit_bytes=32 * 1024 * 1024))

    for y in (y0, y1):
        assert y.shape == (B, S, D)
        assert bool(jnp.all(jnp.isfinite(y)))
        # bf16 matmul operands -> loose tolerance against the fp32 reference.
        assert bool(jnp.allclose(y, ref, rtol=5e-2, atol=2e-3)), \
            float(jnp.max(jnp.abs(y - ref)))

    print("KERNEL_OK")
</pallas_src>

<mosaic_0001>
module attributes {stable_mosaic.version = 11 : i64} {
  func.func @_ffn_kernel(%arg0: i32, %arg1: i32, %arg2: memref<16x64xbf16, #tpu.memory_space<vmem>>, %arg3: memref<64x512xbf16, #tpu.memory_space<vmem>>, %arg4: memref<256x64xbf16, #tpu.memory_space<vmem>>, %arg5: memref<16x64xf32, #tpu.memory_space<vmem>>) attributes {dimension_semantics = [#tpu.dimension_semantics<parallel>, #tpu.dimension_semantics<arbitrary>], iteration_bounds = array<i64: 1, 1>, scalar_prefetch = 0 : i64, scratch_operands = 0 : i64, tpu.core_type = #tpu.core_type<tc>, window_params = [{transform_indices = @transform_0, window_bounds = array<i64: 16, 64>}, {transform_indices = @transform_1, window_bounds = array<i64: 64, 512>}, {transform_indices = @transform_2, window_bounds = array<i64: 256, 64>}, {transform_indices = @transform_3, window_bounds = array<i64: 16, 64>}]} {
    %c0 = arith.constant 0 : index
    %c0_0 = arith.constant 0 : index
    %0 = vector.load %arg2[%c0, %c0_0] : memref<16x64xbf16, #tpu.memory_space<vmem>>, vector<16x64xbf16>
    %c0_1 = arith.constant 0 : index
    %c0_2 = arith.constant 0 : index
    %1 = vector.load %arg3[%c0_1, %c0_2] : memref<64x512xbf16, #tpu.memory_space<vmem>>, vector<64x512xbf16>
    %cst = arith.constant dense<0.000000e+00> : vector<16x512xf32>
    %2 = tpu.matmul %0, %1, %cst {dimension_numbers = #tpu.dot_dimension_numbers<[1], [0], [0], [1], [0, 0, 1, 1], [], []>} : vector<16x64xbf16>, vector<64x512xbf16>, vector<16x512xf32> -> vector<16x512xf32>
    %3 = vector.extract_strided_slice %2 {offsets = [0, 0], sizes = [16, 256], strides = [1, 1]} : vector<16x512xf32> to vector<16x256xf32>
    %4 = vector.extract_strided_slice %2 {offsets = [0, 256], sizes = [16, 256], strides = [1, 1]} : vector<16x512xf32> to vector<16x256xf32>
    %5 = math.absf %3 : vector<16x256xf32>
    %cst_3 = arith.constant 0.000000e+00 : f32
    %6 = vector.broadcast %cst_3 : f32 to vector<16x256xf32>
    %7 = arith.subf %6, %5 : vector<16x256xf32>
    %8 = math.exp %7 : vector<16x256xf32>
    %cst_4 = arith.constant 1.000000e+00 : f32
    %9 = vector.broadcast %cst_4 : f32 to vector<16x256xf32>
    %10 = arith.addf %9, %8 : vector<16x256xf32>
    %11 = tpu.reciprocal %10 : vector<16x256xf32> -> vector<16x256xf32>
    %cst_5 = arith.constant 0.000000e+00 : f32
    %12 = vector.broadcast %cst_5 : f32 to vector<16x256xf32>
    %13 = arith.cmpf oge, %3, %12 : vector<16x256xf32>
    %14 = arith.mulf %8, %11 : vector<16x256xf32>
    %15 = arith.select %13, %11, %14 : vector<16x256xi1>, vector<16x256xf32>
    %16 = arith.mulf %3, %15 : vector<16x256xf32>
    %17 = arith.mulf %16, %4 : vector<16x256xf32>
    %18 = arith.truncf %17 : vector<16x256xf32> to vector<16x256xbf16>
    %c0_6 = arith.constant 0 : index
    %c0_7 = arith.constant 0 : index
    %19 = vector.load %arg4[%c0_6, %c0_7] : memref<256x64xbf16, #tpu.memory_space<vmem>>, vector<256x64xbf16>
    %cst_8 = arith.constant dense<0.000000e+00> : vector<16x64xf32>
    %20 = tpu.matmul %18, %19, %cst_8 {dimension_numbers = #tpu.dot_dimension_numbers<[1], [0], [0], [1], [0, 0, 1, 1], [], []>} : vector<16x256xbf16>, vector<256x64xbf16>, vector<16x64xf32> -> vector<16x64xf32>
    %c0_i32 = arith.constant 0 : i32
    %21 = arith.cmpi eq, %arg1, %c0_i32 : i32
    %22 = arith.extui %21 : i1 to i32
    %c0_i32_9 = arith.constant 0 : i32
    %23 = arith.cmpi ne, %22, %c0_i32_9 : i32
    scf.if %23 {
      %c0_12 = arith.constant 0 : index
      %c0_13 = arith.constant 0 : index
      %27 = vector.load %arg5[%c0_12, %c0_13] : memref<16x64xf32, #tpu.memory_space<vmem>>, vector<16x64xf32>
      tpu.vector_store %arg5[%c0_12, %c0_13], %20 {strides = array<i32>} : memref<16x64xf32, #tpu.memory_space<vmem>>, vector<16x64xf32>,
    } else {
    }
    %c0_i32_10 = arith.constant 0 : i32
    %24 = arith.cmpi sgt, %arg1, %c0_i32_10 : i32
    %25 = arith.extui %24 : i1 to i32
    %c0_i32_11 = arith.constant 0 : i32
    %26 = arith.cmpi ne, %25, %c0_i32_11 : i32
    scf.if %26 {
      %c0_12 = arith.constant 0 : index
      %c0_13 = arith.constant 0 : index
      %27 = vector.load %arg5[%c0_12, %c0_13] : memref<16x64xf32, #tpu.memory_space<vmem>>, vector<16x64xf32>
      %28 = arith.addf %27, %20 : vector<16x64xf32>
      %c0_14 = arith.constant 0 : index
      %c0_15 = arith.constant 0 : index
      %29 = vector.load %arg5[%c0_14, %c0_15] : memref<16x64xf32, #tpu.memory_space<vmem>>, vector<16x64xf32>
      tpu.vector_store %arg5[%c0_14, %c0_15], %28 {strides = array<i32>} : memref<16x64xf32, #tpu.memory_space<vmem>>, vector<16x64xf32>,
    } else {
    }
    return
  }
  func.func @transform_0(%arg0: i32, %arg1: i32) -> (i32, i32) {
    %c0_i32 = arith.constant 0 : i32
    %c0_i32_0 = arith.constant 0 : i32
    return %arg0, %c0_i32 : i32, i32
  }
  func.func @transform_1(%arg0: i32, %arg1: i32) -> (i32, i32) {
    %c0_i32 = arith.constant 0 : i32
    %c0_i32_0 = arith.constant 0 : i32
    return %c0_i32, %arg1 : i32, i32
  }
  func.func @transform_2(%arg0: i32, %arg1: i32) -> (i32, i32) {
    %c0_i32 = arith.constant 0 : i32
    %c0_i32_0 = arith.constant 0 : i32
    return %arg1, %c0_i32 : i32, i32
  }
  func.func @transform_3(%arg0: i32, %arg1: i32) -> (i32, i32) {
    %c0_i32 = arith.constant 0 : i32
    %c0_i32_0 = arith.constant 0 : i32
    return %arg0, %c0_i32 : i32, i32
  }
}

</mosaic_0001>

<bundles_post_ra>
// kernel: tpu_custom_call.1
= control target key start
LH: loop header
LB: loop body
LE: loop exit
PB: predicated region body
PF: predicated region fallthrough
CT: control target
= control target key end

     0   :  { %s899_s0 = inlined_call_operand.vmem [shape: bf16[16,64], index: 0, kind: input, shape index: {}]   ;;  %s900_s1 = inlined_call_operand.vmem [shape: bf16[64,512], index: 1, kind: input, shape index: {}]   ;;  %s901_s2 = inlined_call_operand.vmem [shape: bf16[256,64], index: 2, kind: input, shape index: {}]   ;;  %s902_s3 = inlined_call_operand.hbm [shape: f32[16,64], index: 3, kind: output, shape index: {}]  }
   0x1   :  { %v521_v0 = vld [vmem:[%s900_s1 + $0x60] sm:$0xf]  ;;  %v618_v1 = vld [vmem:[%s900_s1 + $0x6c] sm:$0xf0]  ;;  %v616_v2 = vld [vmem:[%s900_s1 + $0x64] sm:$0xf] }
   0x2   :  { %v522_v3 = vor.u32 %v618_v1, %v521_v0  ;;  %v523_v4 = vld [vmem:[%s900_s1 + $0x70] sm:$0xf0]  ;;  %v505_v5 = vld [vmem:[%s900_s1 + $0x40] sm:$0xf]  ;;  %v614_v6 = vld [vmem:[%s900_s1 + $0x4c] sm:$0xf0] }
   0x3   :  { %v526_v7 = vor.u32 %v616_v2, %v523_v4  ;;  %v612_v8 = vld [vmem:[%s900_s1 + $0x44] sm:$0xf]  ;;  %v507_v9 = vld [vmem:[%s900_s1 + $0x50] sm:$0xf0]  ;;  %v506_v10 = vor.u32 %v614_v6, %v505_v5  ;;  %v489_v12 = vld [vmem:[%s900_s1 + $0x20] sm:$0xf] }
   0x4   :  { %127 = vmatpush.bf16.msra.mxu2 %v522_v3  ;;  %v510_v11 = vor.u32 %v612_v8, %v507_v9  ;;  %v610_v13 = vld [vmem:[%s900_s1 + $0x2c] sm:$0xf0]  ;;  %v608_v14 = vld [vmem:[%s900_s1 + $0x24] sm:$0xf]  ;;  %v491_v15 = vld [vmem:[%s900_s1 + $0x30] sm:$0xf0] }
   0x5   :  { %141 = vmatpush.bf16.msra.mxu3 %v526_v7  ;;  %v490_v16 = vor.u32 %v610_v13, %v489_v12  ;;  %v494_v17 = vor.u32 %v608_v14, %v491_v15  ;;  %v473_v18 = vld [vmem:[%s900_s1] sm:$0xf]  ;;  %v606_v19 = vld [vmem:[%s900_s1 + $0xc] sm:$0xf0]  ;;  %v604_v20 = vld [vmem:[%s900_s1 + $0x4] sm:$0xf] }
   0x6   :  { %v475_v21 = vld [vmem:[%s900_s1 + $0x10] sm:$0xf0]  ;;  %v529_v22 = vld [vmem:[%s900_s1 + $0x68] sm:$0xf]  ;;  %v619_v23 = vld [vmem:[%s900_s1 + $0x74] sm:$0xf0]  ;;  %v474_v26 = vor.u32 %v606_v19, %v473_v18 }
   0x7   :  { %v617_v24 = vld [vmem:[%s900_s1 + $0x6c] sm:$0xf]  ;;  %v531_v25 = vld [vmem:[%s900_s1 + $0x78] sm:$0xf0] }
   0x8   :  { %128 = vmatpush.bf16.msra.mxu2 %v506_v10 }
   0x9   :  { %142 = vmatpush.bf16.msra.mxu3 %v510_v11 }
   0xc   :  { %129 = vmatpush.bf16.msra.mxu2 %v490_v16 }
   0xd   :  { %8 = vsyncpa [#allocation3], 0  ;;  %143 = vmatpush.bf16.msra.mxu3 %v494_v17  ;;  %v478_v27 = vor.u32 %v604_v20, %v475_v21  ;;  %v530_v28 = vor.u32 %v619_v23, %v529_v22  ;;  %v534_v29 = vor.u32 %v617_v24, %v531_v25  ;;  %v513_v30 = vld [vmem:[%s900_s1 + $0x48] sm:$0xf]  ;;  %v615_v31 = vld [vmem:[%s900_s1 + $0x54] sm:$0xf0] }
   0xe   :  { %v603_v32 = vld [vmem:[%s899_s0] sm:$0xff]  ;;  %v613_v33 = vld [vmem:[%s900_s1 + $0x4c] sm:$0xf]  ;;  %v515_v34 = vld [vmem:[%s900_s1 + $0x58] sm:$0xf0]  ;;  %vm119_vm0 = vcmask 523264   ;;  %v514_v35 = vor.u32 %v615_v31, %v513_v30 }
   0xf   :  { %v518_v36 = vor.u32 %v613_v33, %v515_v34  ;;  %v497_v37 = vld [vmem:[%s900_s1 + $0x28] sm:$0xf]  ;;  %v611_v38 = vld [vmem:[%s900_s1 + $0x34] sm:$0xf0]  ;;  %v609_v39 = vld [vmem:[%s900_s1 + $0x2c] sm:$0xf] }
  0x10   :  { %130 = vmatpush.bf16.msra.mxu2 %v474_v26  ;;  %v499_v40 = vld [vmem:[%s900_s1 + $0x38] sm:$0xf0]  ;;  %v498_v41 = vor.u32 %v611_v38, %v497_v37  ;;  %v481_v43 = vld [vmem:[%s900_s1 + $0x8] sm:$0xf]  ;;  %v607_v44 = vld [vmem:[%s900_s1 + $0x14] sm:$0xf0] }
  0x11   :  { %144 = vmatpush.bf16.msra.mxu3 %v478_v27  ;;  %v502_v42 = vor.u32 %v609_v39, %v499_v40  ;;  %v605_v45 = vld [vmem:[%s900_s1 + $0xc] sm:$0xf]  ;;  %v483_v46 = vld [vmem:[%s900_s1 + $0x18] sm:$0xf0]  ;;  %v482_v47 = vor.u32 %v607_v44, %v481_v43  ;;  %v626_v51 = vld [vmem:[%s901_s2 + $0x30] sm:$0xff]  ;;  %s455_s28 = sshll.u32 %s902_s3, 4  ;;  %s456_s28 = int_to_ptr.hbm [resolvable:$true] %s455_s28 }
  0x12   :  { %v486_v48 = vor.u32 %v605_v45, %v483_v46  ;;  %v627_v49 = vld [vmem:[%s901_s2 + $0x38] sm:$0xff]  ;;  %v634_v52 = vld [vmem:[%s901_s2 + $0x70] sm:$0xff]  ;;  %v625_v53 = vld [vmem:[%s901_s2 + $0x28] sm:$0xff]  ;;  %s682_s29 = smov 128   ;;  %s683_s30 = smov 8  }
  0x13   :  { %535 = vmatmul.msk.bf16.vlgmr.msra.gmra.mxu2 %vm119_vm0, %v603_v32  ;;  %v635_v50 = vld [vmem:[%s901_s2 + $0x78] sm:$0xff]  ;;  %405 = vmatpush.bf16.msra.mxu0 %v627_v49  ;;  %v633_v54 = vld [vmem:[%s901_s2 + $0x68] sm:$0xff]  ;;  %v624_v56 = vld [vmem:[%s901_s2 + $0x20] sm:$0xff] }
  0x14   :  { %155 = vmatpush.bf16.msrb.mxu2 %v530_v28  ;;  %536 = vmatmul.msk.bf16.vlgmr.msra.gmra.mxu3 %vm119_vm0, %v603_v32  ;;  %v632_v57 = vld [vmem:[%s901_s2 + $0x60] sm:$0xff]  ;;  %v623_v63 = vld [vmem:[%s901_s2 + $0x18] sm:$0xff]  ;;  %v622_v6 = vld [vmem:[%s901_s2 + $0x10] sm:$0xff] }
  0x15   :  { %169 = vmatpush.bf16.msrb.mxu3 %v534_v29  ;;  %419 = vmatpush.bf16.msra.mxu1 %v635_v50  ;;  %v631_v0 = vld [vmem:[%s901_s2 + $0x58] sm:$0xff]  ;;  %v630_v7 = vld [vmem:[%s901_s2 + $0x50] sm:$0xff]  ;;  %v621_v13 = vld [vmem:[%s901_s2 + $0x8] sm:$0xff] }
  0x16   :  { %v629_v14 = vld [vmem:[%s901_s2 + $0x48] sm:$0xff]  ;;  %v620_v19 = vld [vmem:[%s901_s2] sm:$0xff] }
  0x17   :  { %406 = vmatpush.bf16.msra.mxu0 %v626_v51  ;;  %v628_v20 = vld [vmem:[%s901_s2 + $0x40] sm:$0xff]  ;;  %s681_s2 = smov [#allocation2]  }
  0x18   :  { %156 = vmatpush.bf16.msrb.mxu2 %v514_v35  ;;  %s453_s26 = sshll.u32 %s681_s2, 4  ;;  %s454_s26 = int_to_ptr.vmem [resolvable:$true] %s453_s26 }
  0x19   :  { %170 = vmatpush.bf16.msrb.mxu3 %v518_v36  ;;  %420 = vmatpush.bf16.msra.mxu1 %v634_v52 }
  0x1b   :  { %407 = vmatpush.bf16.msra.mxu0 %v625_v53 }
  0x1c   :  { %157 = vmatpush.bf16.msrb.mxu2 %v498_v41 }
  0x1d   :  { %171 = vmatpush.bf16.msrb.mxu3 %v502_v42  ;;  %421 = vmatpush.bf16.msra.mxu1 %v633_v54 }
  0x1f   :  { %408 = vmatpush.bf16.msra.mxu0 %v624_v56 }
  0x20   :  { %158 = vmatpush.bf16.msrb.mxu2 %v482_v47 }
  0x21   :  { %172 = vmatpush.bf16.msrb.mxu3 %v486_v48  ;;  %422 = vmatpush.bf16.msra.mxu1 %v632_v57 }
  0x23   :  { %537 = vmatmul.msk.bf16.vlgmr.msrb.gmra.mxu2 %vm119_vm0, %v603_v32  ;;  %409 = vmatpush.bf16.msra.mxu0 %v623_v63 }
  0x24   :  { %538 = vmatmul.msk.bf16.vlgmr.msrb.gmra.mxu3 %vm119_vm0, %v603_v32 }
  0x25   :  { %423 = vmatpush.bf16.msra.mxu1 %v631_v0 }
  0x27   :  { %410 = vmatpush.bf16.msra.mxu0 %v622_v6 }
  0x29   :  { %424 = vmatpush.bf16.msra.mxu1 %v630_v7 }
  0x2b   :  { %411 = vmatpush.bf16.msra.mxu0 %v621_v13 }
  0x2d   :  { %425 = vmatpush.bf16.msra.mxu1 %v629_v14 }
  0x2f   :  { %412 = vmatpush.bf16.msra.mxu0 %v620_v19 }
  0x31   :  { %426 = vmatpush.bf16.msra.mxu1 %v628_v20 }
  0x96   :  { %v825_v55 = vpop.f32.mrf.mxu2 }
  0x97   :  { %v179_v58 = vand.u32 2147483647, %v825_v55  ;;  %v834_v59 = vpop.f32.mrf.mxu3  ;;  %vm255_vm10 = vcmp.ge.f32.partialorder %v825_v55, 0.0 }
  0x98   :  { %v180_v60 = vand.u32 2147483647, %v834_v59 }
  0x99   :  { %v183_v61 = vsub.f32 0.0, %v179_v58 }
  0x9a   :  { %v184_v62 = vsub.f32 0.0, %v180_v60 }
  0x9b   :  { %v187_v1 = vmul.f32 1.442695, %v183_v61 }
  0x9c   :  { %v189_v2 = vmul.f32 1.442695, %v184_v62 }
  0x9d   :  { %639 = vpow2.f32 %v187_v1 }
  0x9e   :  { %641 = vpow2.f32 %v189_v2  ;;  %v843_v3 = vpop.f32.mrf.mxu2 }
  0x9f   :  { %v181_v4 = vand.u32 2147483647, %v843_v3  ;;  %v846_v5 = vpop.f32.mrf.mxu3 }
  0xa0   :  { %v182_v8 = vand.u32 2147483647, %v846_v5 }
  0xa1   :  { %v185_v9 = vsub.f32 0.0, %v181_v4 }
  0xa2   :  { %v186_v10 = vsub.f32 0.0, %v182_v8 }
  0xa3   :  { %v640_v11 = vpop.eup %639  ;;  %v191_v12 = vmul.f32 1.442695, %v185_v9 }
  0xa4   :  { %v861_v15 = vpop.eup %641  ;;  %v195_v16 = vadd.f32 1.0, %v640_v11  ;;  %v193_v17 = vmul.f32 1.442695, %v186_v10 }
  0xa5   :  { %v196_v18 = vadd.f32 1.0, %v861_v15  ;;  %643 = vpow2.f32 %v191_v12 }
  0xa6   :  { %645 = vrcp.f32 %v195_v16  ;;  %v210_v30 = vand.u32 2147483648, %v195_v16  ;;  %v208_v33 = vand.u32 2147483647, %v195_v16  ;;  %vm204_vm3 = vweird.f32 %v195_v16  ;;  %v160_v51 = vpop.f32.mrf.mxu2 }
  0xa7   :  { %647 = vrcp.f32 %v196_v18  ;;  %v224_v36 = vand.u32 2147483648, %v196_v18  ;;  %vm218_vm5 = vweird.f32 %v196_v18  ;;  %v222_v40 = vand.u32 2147483647, %v196_v18  ;;  %v174_v61 = vpop.f32.mrf.mxu3 }
  0xa8   :  { %649 = vpow2.f32 %v193_v17  ;;  %v211_v38 = vor.u32 1.1754944e-38, %v210_v30  ;;  %vm209_vm6 = vcmp.eq.f32.partialorder %v208_v33, 8.507059e+37 }
  0xa9   :  { %v225_v46 = vor.u32 1.1754944e-38, %v224_v36  ;;  %vm223_vm8 = vcmp.eq.f32.partialorder %v222_v40, 8.507059e+37 }
  0xab   :  { %v870_v21 = vpop.eup %643 }
  0xac   :  { %v646_v22 = vpop.eup %645  ;;  %v197_v23 = vadd.f32 1.0, %v870_v21 }
  0xad   :  { %v648_v24 = vpop.eup %647  ;;  %v200_v25 = vmul.f32 %v646_v22, %v195_v16  ;;  %vm205_vm1 = vweird.f32 %v646_v22 }
  0xae   :  { %v873_v26 = vpop.eup %649  ;;  %651 = vrcp.f32 %v197_v23  ;;  %v214_v27 = vmul.f32 %v648_v24, %v196_v18  ;;  %vm219_vm2 = vweird.f32 %v648_v24  ;;  %vm206_vm4 = vmor %vm204_vm3, %vm205_vm1  ;;  %v238_v48 = vand.u32 2147483648, %v197_v23  ;;  %v162_v17 = vpop.f32.mrf.mxu2 }
  0xaf   :  { %v876_v28 = vadd.f32 1.0, %v873_v26  ;;  %v201_v29 = vsub.f32 1.0, %v200_v25  ;;  %vm220_vm7 = vmor %vm218_vm5, %vm219_vm2  ;;  %v236_v49 = vand.u32 2147483647, %v197_v23  ;;  %vm232_vm11 = vweird.f32 %v197_v23 }
  0xb0   :  { %v215_v31 = vsub.f32 1.0, %v214_v27  ;;  %v239_v58 = vor.u32 1.1754944e-38, %v238_v48  ;;  %vm256_vm1 = vcmp.ge.f32.partialorder %v834_v59, 0.0  ;;  %vm257_vm2 = vcmp.ge.f32.partialorder %v843_v3, 0.0 }
  0xb1   :  { %653 = vrcp.f32 %v876_v28  ;;  %v202_v32 = vmul.f32 %v646_v22, %v201_v29  ;;  %v252_v60 = vand.u32 2147483648, %v876_v28  ;;  %v250_v0 = vand.u32 2147483647, %v876_v28 }
  0xb2   :  { %v216_v34 = vmul.f32 %v648_v24, %v215_v31  ;;  %vm237_vm14 = vcmp.eq.f32.partialorder %v236_v49, 8.507059e+37  ;;  %vm246_vm15 = vweird.f32 %v876_v28  ;;  %vm258_vm5 = vcmp.ge.f32.partialorder %v846_v5, 0.0 }
  0xb3   :  { %v203_v35 = vadd.f32 %v646_v22, %v202_v32  ;;  %v253_v8 = vor.u32 1.1754944e-38, %v252_v60 }
  0xb4   :  { %v652_v37 = vpop.eup %651  ;;  %v217_v39 = vadd.f32 %v648_v24, %v216_v34 }
  0xb5   :  { %v207_v41 = vsel %vm206_vm4, %v646_v22, %v203_v35  ;;  %v228_v42 = vmul.f32 %v652_v37, %v197_v23  ;;  %vm233_vm9 = vweird.f32 %v652_v37  ;;  %vm251_vm4 = vcmp.eq.f32.partialorder %v250_v0, 8.507059e+37 }
  0xb6   :  { %v212_v43 = vsel %vm209_vm6, %v211_v38, %v207_v41  ;;  %v221_v44 = vsel %vm220_vm7, %v648_v24, %v217_v39  ;;  %vm234_vm12 = vmor %vm232_vm11, %vm233_vm9 }
  0xb7   :  { %v654_v45 = vpop.eup %653  ;;  %v229_v47 = vsub.f32 1.0, %v228_v42  ;;  %v259_v52 = vmul.f32 %v640_v11, %v212_v43  ;;  %v226_v53 = vsel %vm223_vm8, %v225_v46, %v221_v44 }
  0xb8   :  { %v242_v50 = vmul.f32 %v654_v45, %v876_v28  ;;  %v260_v62 = vmul.f32 %v861_v15, %v226_v53  ;;  %vm247_vm13 = vweird.f32 %v654_v45 }
  0xb9   :  { %v230_v54 = vmul.f32 %v652_v37, %v229_v47  ;;  %v263_v1 = vsel %vm255_vm10, %v212_v43, %v259_v52  ;;  %vm248_vm3 = vmor %vm246_vm15, %vm247_vm13 }
  0xba   :  { %v243_v56 = vsub.f32 1.0, %v242_v50  ;;  %v267_v9 = vmul.f32 %v263_v1, %v825_v55  ;;  %v264_v10 = vsel %vm256_vm1, %v226_v53, %v260_v62  ;;  %v176_v55 = vpop.f32.mrf.mxu3 }
  0xbb   :  { %v231_v57 = vadd.f32 %v652_v37, %v230_v54  ;;  %v268_v16 = vmul.f32 %v264_v10, %v834_v59 }
  0xbc   :  { %v244_v63 = vmul.f32 %v654_v45, %v243_v56  ;;  %v271_v18 = vmul.f32 %v267_v9, %v160_v51 }
  0xbd   :  { %v235_v2 = vsel %vm234_vm12, %v652_v37, %v231_v57  ;;  %v272_v23 = vmul.f32 %v268_v16, %v174_v61 }
  0xbe   :  { %v240_v4 = vsel %vm237_vm14, %v239_v58, %v235_v2  ;;  %v245_v6 = vadd.f32 %v654_v45, %v244_v63 }
  0xbf   :  { %v261_v7 = vmul.f32 %v870_v21, %v240_v4 }
  0xc0   :  { %v249_v11 = vsel %vm248_vm3, %v654_v45, %v245_v6 }
  0xc1   :  { %v265_v12 = vsel %vm257_vm2, %v240_v4, %v261_v7  ;;  %v254_v13 = vsel %vm251_vm4, %v253_v8, %v249_v11 }
  0xc2   :  { %v269_v14 = vmul.f32 %v265_v12, %v843_v3  ;;  %v262_v15 = vmul.f32 %v873_v26, %v254_v13 }
  0xc4   :  { %v273_v19 = vmul.f32 %v269_v14, %v162_v17  ;;  %v266_v20 = vsel %vm258_vm5, %v254_v13, %v262_v15 }
  0xc5   :  { %v270_v21 = vmul.f32 %v266_v20, %v846_v5 }
  0xc6   :  { %v275_v22 = vpack.c.bf16 %v273_v19, %v271_v18 }
  0xc7   :  { %v274_v24 = vmul.f32 %v270_v21, %v176_v55 }
  0xc8   :  { %413 = vmatmul.bf16.vlgmr.msra.gmra.mxu0 %v275_v22 }
  0xc9   :  { %v276_v25 = vpack.c.bf16 %v274_v24, %v272_v23 }
  0xcb   :  { %427 = vmatmul.bf16.vlgmr.msra.gmra.mxu1 %v276_v25 }
 0x145   :  { %v414_v3 = vpop.f32.mrf.mxu0 }
 0x148   :  { %v428_v27 = vpop.f32.mrf.mxu1 }
 0x149   :  { %v429_v26 = vadd.f32 %v428_v27, %v414_v3 }
 0x14b   :  { %437 = vst.msk [vmem:[#allocation2] sm:$0xff] %vm119_vm0, %v429_v26 }
 0x14d   :  { %v416_v59 = vpop.f32.mrf.mxu0 }
 0x150   :  { %v430_v5 = vpop.f32.mrf.mxu1 }
 0x151   :  { %v431_v28 = vadd.f32 %v430_v5, %v416_v59 }
 0x153   :  { %438 = vst.msk [vmem:[#allocation2 + $0x8] sm:$0xff] %vm119_vm0, %v431_v28 }
 0x154   :  { %461 = dma.vmem_to_hbm [thread:$0]  %s454_s26, 256, %s456_s28, [#allocation3], %s682_s29, %s682_s29, %s683_s30  }
 0x155   :  { %679 = dma.done.wait [#allocation3], 256  }
 0x156   :  { %680 = vsyncadd [#allocation3], 4294967040 }
 0x157   :  { %466 = vsyncpa [#allocation3], 1 }

</bundles_post_ra>
